<compile_context>
chip_gen: v7x
topology: tpu7x:2x2x1
jax: 0.10.0
libtpu: 0.0.40
codegen_flags: <defaults>
</compile_context>

<pallas_src>
import math
from functools import partial

import jax
import jax.numpy as jnp
from jax.experimental import pallas as pl
from jax.experimental.pallas import tpu as pltpu


# ---------------------------------------------------------------------------
# Tile-size helpers
# ---------------------------------------------------------------------------
def _sublane_align(dtype):
    """Minimum sublane tile: 8 rows for 32-bit, 16 for 16-bit, 32 for 8-bit."""
    itemsize = jnp.dtype(dtype).itemsize
    return max(8, 32 // itemsize)


def _pick_tile(dim, target, align):
    """Largest tile <= target that divides `dim` and is a multiple of `align`;
    falls back to the full dim (always a legal block)."""
    if dim <= target:
        return dim
    t = (target // align) * align
    while t >= align:
        if dim % t == 0:
            return t
        t -= align
    # TODO(synk): pad awkward dims instead of falling back to one huge block.
    return dim


# ---------------------------------------------------------------------------
# Kernel 1: fused QKV projection (tiled matmul, three lane-dense outputs).
#   q = (x @ Wq) * scale,  k = x @ Wk,  v = x @ Wv     (qkv_bias=False)
# The softmax scale is folded into q here (finalize-time VPU mul).
# ---------------------------------------------------------------------------
def _qkv_proj_kernel(x_ref, wq_ref, wk_ref, wv_ref,
                     q_ref, k_ref, v_ref,
                     qacc, kacc, vacc, *, scale):
    kk = pl.program_id(2)

    @pl.when(kk == 0)
    def _():
        qacc[...] = jnp.zeros_like(qacc)
        kacc[...] = jnp.zeros_like(kacc)
        vacc[...] = jnp.zeros_like(vacc)

    x = x_ref[...]
    qacc[...] += jnp.dot(x, wq_ref[...], preferred_element_type=jnp.float32)
    kacc[...] += jnp.dot(x, wk_ref[...], preferred_element_type=jnp.float32)
    vacc[...] += jnp.dot(x, wv_ref[...], preferred_element_type=jnp.float32)

    @pl.when(kk == pl.num_programs(2) - 1)
    def _():
        q_ref[...] = (qacc[...] * scale).astype(q_ref.dtype)
        k_ref[...] = kacc[...].astype(k_ref.dtype)
        v_ref[...] = vacc[...].astype(v_ref.dtype)


def pallas_qkv_proj(x2d, w_qkv, *, scale, tm=256, tn=256, tk=512):
    """x2d: (M, K); w_qkv: (K, 3C)  ->  three (M, C) arrays (q pre-scaled)."""
    M, K = x2d.shape
    C = w_qkv.shape[1] // 3
    tm = _pick_tile(M, tm, _sublane_align(x2d.dtype))
    tn = _pick_tile(C, tn, 128)
    tk = _pick_tile(K, tk, 128)
    grid = (M // tm, C // tn, K // tk)
    nj = C // tn  # number of column blocks per projection inside w_qkv

    out_sds = jax.ShapeDtypeStruct((M, C), x2d.dtype)
    out_spec = pl.BlockSpec((tm, tn), lambda i, j, kk: (i, j))

    return pl.pallas_call(
        partial(_qkv_proj_kernel, scale=scale),
        out_shape=(out_sds, out_sds, out_sds),
        grid=grid,
        in_specs=[
            pl.BlockSpec((tm, tk), lambda i, j, kk: (i, kk)),
            # Same fused weight, three column-offset windows (no HBM copies).
            pl.BlockSpec((tk, tn), lambda i, j, kk: (kk, j)),
            pl.BlockSpec((tk, tn), lambda i, j, kk: (kk, j + nj)),
            pl.BlockSpec((tk, tn), lambda i, j, kk: (kk, j + 2 * nj)),
        ],
        out_specs=(out_spec, out_spec, out_spec),
        scratch_shapes=[pltpu.VMEM((tm, tn), jnp.float32)] * 3,
        compiler_params=pltpu.CompilerParams(
            dimension_semantics=("parallel", "parallel", "arbitrary")),
    )(x2d, w_qkv, w_qkv, w_qkv)


# ---------------------------------------------------------------------------
# Kernel 2: flash-style MHSA (online softmax over streamed KV tiles) with the
# output projection fused into the epilogue.
#   grid = (B, N/tq, N/tkv); q block (1,tq,C), k/v blocks (1,tkv,C),
#   output block (1,tq,C) already in (B, N, H*D) layout.
# Heads are handled in one batched dot_general per step; q is reshaped to
# head-major layout once per (b, qi) and cached in VMEM scratch.
# ---------------------------------------------------------------------------
def _flash_mhsa_proj_kernel(q_ref, k_ref, v_ref, wp_ref, bp_ref, o_ref,
                            q_sc, m_sc, l_sc, acc_sc,
                            *, num_heads, head_dim):
    ki = pl.program_id(2)

    @pl.when(ki == 0)
    def _():
        tq = q_ref.shape[1]
        qh = q_ref[0].reshape(tq, num_heads, head_dim)
        q_sc[...] = jnp.transpose(qh, (1, 0, 2))          # (H, tq, D), reused
        m_sc[...] = jnp.full_like(m_sc, -jnp.inf)
        l_sc[...] = jnp.zeros_like(l_sc)
        acc_sc[...] = jnp.zeros_like(acc_sc)

    tkv = k_ref.shape[1]
    k = jnp.transpose(k_ref[0].reshape(tkv, num_heads, head_dim), (1, 0, 2))
    v = jnp.transpose(v_ref[0].reshape(tkv, num_heads, head_dim), (1, 0, 2))

    # Scores (H, tq, tkv); softmax scale was folded into q by the QKV kernel.
    s = jnp.einsum("hqd,hkd->hqk", q_sc[...], k,
                   preferred_element_type=jnp.float32)

    m_prev = m_sc[...]
    m_new = jnp.maximum(m_prev, jnp.max(s, axis=-1, keepdims=True))
    alpha = jnp.exp(m_prev - m_new)
    p = jnp.exp(s - m_new)
    l_sc[...] = alpha * l_sc[...] + jnp.sum(p, axis=-1, keepdims=True)
    acc_sc[...] = alpha * acc_sc[...] + jnp.einsum(
        "hqk,hkd->hqd", p.astype(v.dtype), v,
        preferred_element_type=jnp.float32)
    m_sc[...] = m_new

    @pl.when(ki == pl.num_programs(2) - 1)
    def _():
        inv_l = pl.reciprocal(l_sc[...], approx=False)
        o = acc_sc[...] * inv_l                            # (H, tq, D) f32
        tq = o.shape[1]
        o = jnp.transpose(o, (1, 0, 2)).reshape(tq, num_heads * head_dim)
        # Fused output projection: o @ W_proj + b (W_proj resident in VMEM),
        # saving a full (B, N, C) HBM round trip.
        out = jnp.dot(o.astype(wp_ref.dtype), wp_ref[...],
                      preferred_element_type=jnp.float32)
        out = out + bp_ref[...].astype(jnp.float32)
        o_ref[0] = out.astype(o_ref.dtype)


def pallas_flash_mhsa_proj(q, k, v, w_proj, b_proj, *, num_heads,
                           tq=256, tkv=256):
    """q, k, v: (B, N, C) head-major columns -> (B, N, C) projected output."""
    B, N, C = q.shape
    head_dim = C // num_heads
    align = _sublane_align(q.dtype)
    tq = _pick_tile(N, tq, align)
    tkv = _pick_tile(N, tkv, align)
    grid = (B, N // tq, N // tkv)

    q_spec = pl.BlockSpec((1, tq, C), lambda b, qi, ki: (b, qi, 0))
    kv_spec = pl.BlockSpec((1, tkv, C), lambda b, qi, ki: (b, ki, 0))
    o_spec = pl.BlockSpec((1, tq, C), lambda b, qi, ki: (b, qi, 0))
    wp_spec = pl.BlockSpec((C, C), lambda b, qi, ki: (0, 0))       # resident
    bp_spec = pl.BlockSpec((1, C), lambda b, qi, ki: (0, 0))       # resident

    return pl.pallas_call(
        partial(_flash_mhsa_proj_kernel, num_heads=num_heads,
                head_dim=head_dim),
        out_shape=jax.ShapeDtypeStruct((B, N, C), q.dtype),
        grid=grid,
        in_specs=[q_spec, kv_spec, kv_spec, wp_spec, bp_spec],
        out_specs=o_spec,
        scratch_shapes=[
            pltpu.VMEM((num_heads, tq, head_dim), q.dtype),        # q heads
            pltpu.VMEM((num_heads, tq, 1), jnp.float32),           # m
            pltpu.VMEM((num_heads, tq, 1), jnp.float32),           # l
            pltpu.VMEM((num_heads, tq, head_dim), jnp.float32),    # acc
        ],
        compiler_params=pltpu.CompilerParams(
            dimension_semantics=("parallel", "parallel", "arbitrary"),
            vmem_limit_bytes=32 * 1024 * 1024),
    )(q, k, v, w_proj, b_proj.reshape(1, C))


# ---------------------------------------------------------------------------
# Full Attention forward (matches the PyTorch module semantics)
# ---------------------------------------------------------------------------
def attention_forward(x, params, num_heads):
    B, N, C = x.shape
    head_dim = C // num_heads
    scale = head_dim ** (-0.5)

    x2d = x.reshape(B * N, C)
    # QKV projection (no bias), scale folded into q.
    q2d, k2d, v2d = pallas_qkv_proj(x2d, params["w_qkv"], scale=scale)

    # Flash attention + fused output projection; result already (B, N, C).
    out = pallas_flash_mhsa_proj(
        q2d.reshape(B, N, C), k2d.reshape(B, N, C), v2d.reshape(B, N, C),
        params["w_proj"], params["b_proj"], num_heads=num_heads)
    return out


# ---------------------------------------------------------------------------
# Pure-JAX reference for the correctness check
# ---------------------------------------------------------------------------
def attention_reference(x, params, num_heads):
    B, N, C = x.shape
    head_dim = C // num_heads
    scale = head_dim ** (-0.5)
    qkv = x @ params["w_qkv"]
    qkv = qkv.reshape(B, N, 3, num_heads, head_dim)
    qkv = jnp.transpose(qkv, (2, 0, 3, 1, 4))
    q, k, v = qkv[0], qkv[1], qkv[2]
    attn = jnp.einsum("bhnd,bhmd->bhnm", q, k) * scale
    attn = jax.nn.softmax(attn, axis=-1)
    o = jnp.einsum("bhnm,bhmd->bhnd", attn, v)
    o = jnp.transpose(o, (0, 2, 1, 3)).reshape(B, N, C)
    return o @ params["w_proj"] + params["b_proj"]


if __name__ == "__main__":
    # Small shapes consistent with the module (dim divisible by num_heads).
    B, N, C = 2, 32, 128
    num_heads = 8

    key = jax.random.PRNGKey(0)
    k_x, k_qkv, k_proj_w, k_proj_b = jax.random.split(key, 4)

    x = jax.random.normal(k_x, (B, N, C), dtype=jnp.float32)

    # Deterministic parameter init (uniform, same bounds as nn.Linear default).
    bound = 1.0 / math.sqrt(C)
    params = {
        # stored as (in, out) so kernels compute x @ W
        "w_qkv": jax.random.uniform(k_qkv, (C, 3 * C), jnp.float32,
                                    -bound, bound),
        "w_proj": jax.random.uniform(k_proj_w, (C, C), jnp.float32,
                                     -bound, bound),
        "b_proj": jax.random.uniform(k_proj_b, (C,), jnp.float32,
                                     -bound, bound),
    }

    out = attention_forward(x, params, num_heads)
    out = jax.block_until_ready(out)

    ref = attention_reference(x, params, num_heads)
    assert out.shape == (B, N, C)
    assert jnp.allclose(out, ref, atol=1e-3, rtol=1e-3), "mismatch vs reference"

    print("KERNEL_OK")
</pallas_src>

<mosaic_0001>
module attributes {stable_mosaic.version = 11 : i64} {
  func.func @_qkv_proj_kernel(%arg0: i32, %arg1: i32, %arg2: i32, %arg3: memref<64x128xf32, #tpu.memory_space<vmem>>, %arg4: memref<128x128xf32, #tpu.memory_space<vmem>>, %arg5: memref<128x128xf32, #tpu.memory_space<vmem>>, %arg6: memref<128x128xf32, #tpu.memory_space<vmem>>, %arg7: memref<64x128xf32, #tpu.memory_space<vmem>>, %arg8: memref<64x128xf32, #tpu.memory_space<vmem>>, %arg9: memref<64x128xf32, #tpu.memory_space<vmem>>, %arg10: memref<64x128xf32, #tpu.memory_space<vmem>>, %arg11: memref<64x128xf32, #tpu.memory_space<vmem>>, %arg12: memref<64x128xf32, #tpu.memory_space<vmem>>) attributes {dimension_semantics = [#tpu.dimension_semantics<parallel>, #tpu.dimension_semantics<parallel>, #tpu.dimension_semantics<arbitrary>], iteration_bounds = array<i64: 1, 1, 1>, scalar_prefetch = 0 : i64, scratch_operands = 3 : i64, tpu.core_type = #tpu.core_type<tc>, window_params = [{transform_indices = @transform_0, window_bounds = array<i64: 64, 128>}, {transform_indices = @transform_1, window_bounds = array<i64: 128, 128>}, {transform_indices = @transform_2, window_bounds = array<i64: 128, 128>}, {transform_indices = @transform_3, window_bounds = array<i64: 128, 128>}, {transform_indices = @transform_4, window_bounds = array<i64: 64, 128>}, {transform_indices = @transform_5, window_bounds = array<i64: 64, 128>}, {transform_indices = @transform_6, window_bounds = array<i64: 64, 128>}]} {
    %c0_i32 = arith.constant 0 : i32
    %0 = arith.cmpi eq, %arg2, %c0_i32 : i32
    %1 = arith.extui %0 : i1 to i32
    %c0_i32_0 = arith.constant 0 : i32
    %2 = arith.cmpi ne, %1, %c0_i32_0 : i32
    scf.if %2 {
      %cst_24 = arith.constant 0.000000e+00 : f32
      %22 = vector.broadcast %cst_24 : f32 to vector<64x128xf32>
      %c0_25 = arith.constant 0 : index
      %c0_26 = arith.constant 0 : index
      %23 = vector.load %arg10[%c0_25, %c0_26] : memref<64x128xf32, #tpu.memory_space<vmem>>, vector<64x128xf32>
      tpu.vector_store %arg10[%c0_25, %c0_26], %22 {strides = array<i32>} : memref<64x128xf32, #tpu.memory_space<vmem>>, vector<64x128xf32>,
      %cst_27 = arith.constant 0.000000e+00 : f32
      %24 = vector.broadcast %cst_27 : f32 to vector<64x128xf32>
      %c0_28 = arith.constant 0 : index
      %c0_29 = arith.constant 0 : index
      %25 = vector.load %arg11[%c0_28, %c0_29] : memref<64x128xf32, #tpu.memory_space<vmem>>, vector<64x128xf32>
      tpu.vector_store %arg11[%c0_28, %c0_29], %24 {strides = array<i32>} : memref<64x128xf32, #tpu.memory_space<vmem>>, vector<64x128xf32>,
      %cst_30 = arith.constant 0.000000e+00 : f32
      %26 = vector.broadcast %cst_30 : f32 to vector<64x128xf32>
      %c0_31 = arith.constant 0 : index
      %c0_32 = arith.constant 0 : index
      %27 = vector.load %arg12[%c0_31, %c0_32] : memref<64x128xf32, #tpu.memory_space<vmem>>, vector<64x128xf32>
      tpu.vector_store %arg12[%c0_31, %c0_32], %26 {strides = array<i32>} : memref<64x128xf32, #tpu.memory_space<vmem>>, vector<64x128xf32>,
    } else {
    }
    %c0 = arith.constant 0 : index
    %c0_1 = arith.constant 0 : index
    %3 = vector.load %arg3[%c0, %c0_1] : memref<64x128xf32, #tpu.memory_space<vmem>>, vector<64x128xf32>
    %c0_2 = arith.constant 0 : index
    %c0_3 = arith.constant 0 : index
    %4 = vector.load %arg10[%c0_2, %c0_3] : memref<64x128xf32, #tpu.memory_space<vmem>>, vector<64x128xf32>
    %c0_4 = arith.constant 0 : index
    %c0_5 = arith.constant 0 : index
    %5 = vector.load %arg4[%c0_4, %c0_5] : memref<128x128xf32, #tpu.memory_space<vmem>>, vector<128x128xf32>
    %cst = arith.constant dense<0.000000e+00> : vector<64x128xf32>
    %6 = tpu.matmul %3, %5, %cst {dimension_numbers = #tpu.dot_dimension_numbers<[1], [0], [0], [1], [0, 0, 1, 1], [], []>} : vector<64x128xf32>, vector<128x128xf32>, vector<64x128xf32> -> vector<64x128xf32>
    %7 = arith.addf %4, %6 : vector<64x128xf32>
    %c0_6 = arith.constant 0 : index
    %c0_7 = arith.constant 0 : index
    %8 = vector.load %arg10[%c0_6, %c0_7] : memref<64x128xf32, #tpu.memory_space<vmem>>, vector<64x128xf32>
    tpu.vector_store %arg10[%c0_6, %c0_7], %7 {strides = array<i32>} : memref<64x128xf32, #tpu.memory_space<vmem>>, vector<64x128xf32>,
    %c0_8 = arith.constant 0 : index
    %c0_9 = arith.constant 0 : index
    %9 = vector.load %arg11[%c0_8, %c0_9] : memref<64x128xf32, #tpu.memory_space<vmem>>, vector<64x128xf32>
    %c0_10 = arith.constant 0 : index
    %c0_11 = arith.constant 0 : index
    %10 = vector.load %arg5[%c0_10, %c0_11] : memref<128x128xf32, #tpu.memory_space<vmem>>, vector<128x128xf32>
    %cst_12 = arith.constant dense<0.000000e+00> : vector<64x128xf32>
    %11 = tpu.matmul %3, %10, %cst_12 {dimension_numbers = #tpu.dot_dimension_numbers<[1], [0], [0], [1], [0, 0, 1, 1], [], []>} : vector<64x128xf32>, vector<128x128xf32>, vector<64x128xf32> -> vector<64x128xf32>
    %12 = arith.addf %9, %11 : vector<64x128xf32>
    %c0_13 = arith.constant 0 : index
    %c0_14 = arith.constant 0 : index
    %13 = vector.load %arg11[%c0_13, %c0_14] : memref<64x128xf32, #tpu.memory_space<vmem>>, vector<64x128xf32>
    tpu.vector_store %arg11[%c0_13, %c0_14], %12 {strides = array<i32>} : memref<64x128xf32, #tpu.memory_space<vmem>>, vector<64x128xf32>,
    %c0_15 = arith.constant 0 : index
    %c0_16 = arith.constant 0 : index
    %14 = vector.load %arg12[%c0_15, %c0_16] : memref<64x128xf32, #tpu.memory_space<vmem>>, vector<64x128xf32>
    %c0_17 = arith.constant 0 : index
    %c0_18 = arith.constant 0 : index
    %15 = vector.load %arg6[%c0_17, %c0_18] : memref<128x128xf32, #tpu.memory_space<vmem>>, vector<128x128xf32>
    %cst_19 = arith.constant dense<0.000000e+00> : vector<64x128xf32>
    %16 = tpu.matmul %3, %15, %cst_19 {dimension_numbers = #tpu.dot_dimension_numbers<[1], [0], [0], [1], [0, 0, 1, 1], [], []>} : vector<64x128xf32>, vector<128x128xf32>, vector<64x128xf32> -> vector<64x128xf32>
    %17 = arith.addf %14, %16 : vector<64x128xf32>
    %c0_20 = arith.constant 0 : index
    %c0_21 = arith.constant 0 : index
    %18 = vector.load %arg12[%c0_20, %c0_21] : memref<64x128xf32, #tpu.memory_space<vmem>>, vector<64x128xf32>
    tpu.vector_store %arg12[%c0_20, %c0_21], %17 {strides = array<i32>} : memref<64x128xf32, #tpu.memory_space<vmem>>, vector<64x128xf32>,
    %c0_i32_22 = arith.constant 0 : i32
    %19 = arith.cmpi eq, %arg2, %c0_i32_22 : i32
    %20 = arith.extui %19 : i1 to i32
    %c0_i32_23 = arith.constant 0 : i32
    %21 = arith.cmpi ne, %20, %c0_i32_23 : i32
    scf.if %21 {
      %c0_24 = arith.constant 0 : index
      %c0_25 = arith.constant 0 : index
      %22 = vector.load %arg10[%c0_24, %c0_25] : memref<64x128xf32, #tpu.memory_space<vmem>>, vector<64x128xf32>
      %cst_26 = arith.constant 2.500000e-01 : f32
      %23 = vector.broadcast %cst_26 : f32 to vector<64x128xf32>
      %24 = arith.mulf %22, %23 : vector<64x128xf32>
      %c0_27 = arith.constant 0 : index
      %c0_28 = arith.constant 0 : index
      %25 = vector.load %arg7[%c0_27, %c0_28] : memref<64x128xf32, #tpu.memory_space<vmem>>, vector<64x128xf32>
      tpu.vector_store %arg7[%c0_27, %c0_28], %24 {strides = array<i32>} : memref<64x128xf32, #tpu.memory_space<vmem>>, vector<64x128xf32>,
      %c0_29 = arith.constant 0 : index
      %c0_30 = arith.constant 0 : index
      %26 = vector.load %arg11[%c0_29, %c0_30] : memref<64x128xf32, #tpu.memory_space<vmem>>, vector<64x128xf32>
      %c0_31 = arith.constant 0 : index
      %c0_32 = arith.constant 0 : index
      %27 = vector.load %arg8[%c0_31, %c0_32] : memref<64x128xf32, #tpu.memory_space<vmem>>, vector<64x128xf32>
      tpu.vector_store %arg8[%c0_31, %c0_32], %26 {strides = array<i32>} : memref<64x128xf32, #tpu.memory_space<vmem>>, vector<64x128xf32>,
      %c0_33 = arith.constant 0 : index
      %c0_34 = arith.constant 0 : index
      %28 = vector.load %arg12[%c0_33, %c0_34] : memref<64x128xf32, #tpu.memory_space<vmem>>, vector<64x128xf32>
      %c0_35 = arith.constant 0 : index
      %c0_36 = arith.constant 0 : index
      %29 = vector.load %arg9[%c0_35, %c0_36] : memref<64x128xf32, #tpu.memory_space<vmem>>, vector<64x128xf32>
      tpu.vector_store %arg9[%c0_35, %c0_36], %28 {strides = array<i32>} : memref<64x128xf32, #tpu.memory_space<vmem>>, vector<64x128xf32>,
    } else {
    }
    return
  }
  func.func @transform_0(%arg0: i32, %arg1: i32, %arg2: i32) -> (i32, i32) {
    %c0_i32 = arith.constant 0 : i32
    return %arg0, %arg2 : i32, i32
  }
  func.func @transform_1(%arg0: i32, %arg1: i32, %arg2: i32) -> (i32, i32) {
    %c0_i32 = arith.constant 0 : i32
    return %arg2, %arg1 : i32, i32
  }
  func.func @transform_2(%arg0: i32, %arg1: i32, %arg2: i32) -> (i32, i32) {
    %c1_i32 = arith.constant 1 : i32
    %0 = arith.addi %arg1, %c1_i32 : i32
    %c0_i32 = arith.constant 0 : i32
    return %arg2, %0 : i32, i32
  }
  func.func @transform_3(%arg0: i32, %arg1: i32, %arg2: i32) -> (i32, i32) {
    %c2_i32 = arith.constant 2 : i32
    %0 = arith.addi %arg1, %c2_i32 : i32
    %c0_i32 = arith.constant 0 : i32
    return %arg2, %0 : i32, i32
  }
  func.func @transform_4(%arg0: i32, %arg1: i32, %arg2: i32) -> (i32, i32) {
    %c0_i32 = arith.constant 0 : i32
    return %arg0, %arg1 : i32, i32
  }
  func.func @transform_5(%arg0: i32, %arg1: i32, %arg2: i32) -> (i32, i32) {
    %c0_i32 = arith.constant 0 : i32
    return %arg0, %arg1 : i32, i32
  }
  func.func @transform_6(%arg0: i32, %arg1: i32, %arg2: i32) -> (i32, i32) {
    %c0_i32 = arith.constant 0 : i32
    return %arg0, %arg1 : i32, i32
  }
}

</mosaic_0001>

<bundles_post_ra>
// kernel: tpu_custom_call.1
= control target key start
LH: loop header
LB: loop body
LE: loop exit
PB: predicated region body
PF: predicated region fallthrough
CT: control target
= control target key end

     0   :  { %12 = vsyncpa [#allocation6], 0  ;;  %s1355_s0 = inlined_call_operand.hbm [shape: f32[64,128], index: 0, kind: input, shape index: {}]   ;;  %s1356_s1 = inlined_call_operand.hbm [shape: f32[128,384], index: 1, kind: input, shape index: {}]   ;;  %s1357_s2 = inlined_call_operand.hbm [shape: f32[128,384], index: 2, kind: input, shape index: {}]   ;;  %s1358_s3 = inlined_call_operand.hbm [shape: f32[128,384], index: 3, kind: input, shape index: {}]   ;;  %s1359_s4 = inlined_call_operand.hbm [shape: f32[64,128], index: 4, kind: output, shape index: {0}]   ;;  %s1360_s5 = inlined_call_operand.hbm [shape: f32[64,128], index: 5, kind: output, shape index: {1}]   ;;  %s1361_s6 = inlined_call_operand.hbm [shape: f32[64,128], index: 6, kind: output, shape index: {2}]  }
   0x1   :  { %13 = vsyncpa [#allocation9], 0 }
   0x2   :  { %14 = vsyncpa [#allocation12], 0 }
   0x3   :  { %15 = vsyncpa [#allocation7], 0 }
   0x4   :  { %16 = vsyncpa [#allocation15], 0  ;;  %s1163_s21 = smov [#allocation8]   ;;  %s1164_s23 = smov [#allocation5]  }
   0x5   :  { %s34_s22 = sshll.u32 %s1163_s21, 4  ;;  %s22_s24 = sshll.u32 %s1164_s23, 4  ;;  %s35_s22 = int_to_ptr.vmem [resolvable:$true] %s34_s22  ;;  %s23_s24 = int_to_ptr.vmem [resolvable:$true] %s22_s24 }
   0x6   :  { %s993_s27 = scalar_lea.hbm %s1356_s1, 2048  ;;  %s995_s8 = scalar_lea.hbm %s1356_s1, 6144 }
   0x7   :  { %p994_p0 = scmp.ne.s32.totalorder %s1356_s1, %s993_s27  ;;  %p996_p1 = scmp.lt.u32.totalorder %s995_s8, %s993_s27 }
   0x8   :  { %p997_p2 = scmp.lt.u32.totalorder %s993_s27, %s1356_s1 }
   0xa   :  { %p998_p3 = por %p997_p2, %p996_p1 }
   0xc   :  { %p999_p4 = pnand %p998_p3, %p994_p0 }
   0xe   :  { %1002 = shalt.err (!%p999_p4)
}
   0xf   :  { %s1003_s11 = scalar_lea.vmem %s35_s22, 2048  ;;  %p1008_p6 = scmp.lt.s32.totalorder %s35_s22, %s35_s22 }
  0x10   :  { %p1004_p5 = scmp.ne.s32.totalorder %s35_s22, %s1003_s11  ;;  %p1009_p7 = scmp.lt.s32.totalorder %s1003_s11, %s1003_s11 }
  0x12   :  { %p1010_p8 = por %p1009_p7, %p1008_p6 }
  0x14   :  { %p1011_p9 = pnand %p1010_p8, %p1004_p5 }
  0x16   :  { %1014 = shalt.err (!%p1011_p9)
}
  0x17   :  { %s1165_s12 = smov 384   ;;  %s1166_s13 = smov 128  }
  0x18   :  { %s1167_s14 = smov 8   ;;  %s1229_s19 = scalar_lea.hbm %s1357_s2, 128 }
  0x19   :  { %40 = dma.hbm_to_vmem [thread:$0]  %s1356_s1, 2048, %s35_s22, [#allocation9], %s1165_s12, %s1166_s13, %s1167_s14  }
  0x1a   :  { %s1015_s23 = scalar_lea.hbm %s1355_s0, 1024 }
  0x1b   :  { %p1016_p10 = scmp.ne.s32.totalorder %s1355_s0, %s1015_s23  ;;  %p1019_p11 = scmp.lt.u32.totalorder %s1015_s23, %s1355_s0 }
  0x1d   :  { %p1021_p12 = pnand %p1019_p11, %p1016_p10 }
  0x1f   :  { %1024 = shalt.err (!%p1021_p12)
}
  0x20   :  { %s1025_s1 = scalar_lea.vmem %s23_s24, 1024  ;;  %p1030_p0 = scmp.lt.s32.totalorder %s23_s24, %s23_s24 }
  0x21   :  { %p1026_p13 = scmp.ne.s32.totalorder %s23_s24, %s1025_s1  ;;  %p1031_p1 = scmp.lt.s32.totalorder %s1025_s1, %s1025_s1 }
  0x23   :  { %p1032_p2 = por %p1031_p1, %p1030_p0 }
  0x25   :  { %p1033_p3 = pnand %p1032_p2, %p1026_p13 }
  0x27   :  { %1036 = shalt.err (!%p1033_p3)
}
  0x28   :  { %28 = dma.hbm_to_vmem [thread:$0]  %s1355_s0, 1024, %s23_s24, [#allocation6], %s1166_s13, %s1166_s13, %s1167_s14  }
  0x29   :  { %s1249_s8 = scalar_lea.hbm %s1358_s3, 256  ;;  %s1168_s9 = smov [#allocation10]  }
  0x2a   :  { %s49_s10 = sshll.u32 %s1168_s9, 4  ;;  %s1169_s11 = smov [#allocation11]   ;;  %s50_s10 = int_to_ptr.vmem [resolvable:$true] %s49_s10 }
  0x2b   :  { %s64_s15 = sshll.u32 %s1169_s11, 4  ;;  %s1061_s18 = scalar_lea.hbm %s1357_s2, 2176  ;;  %s65_s15 = int_to_ptr.vmem [resolvable:$true] %s64_s15 }
  0x2c   :  { %p1038_p4 = scmp.ne.s32.totalorder %s1229_s19, %s1061_s18  ;;  %s1039_s23 = scalar_lea.hbm %s1357_s2, 6144 }
  0x2d   :  { %p1040_p5 = scmp.lt.u32.totalorder %s1229_s19, %s1357_s2  ;;  %p1041_p6 = scmp.lt.u32.totalorder %s1039_s23, %s1061_s18 }
  0x2e   :  { %p1043_p8 = scmp.lt.u32.totalorder %s1061_s18, %s1229_s19 }
  0x2f   :  { %p1042_p7 = por %p1041_p6, %p1040_p5 }
  0x31   :  { %p1044_p9 = por %p1043_p8, %p1042_p7 }
  0x33   :  { %p1045_p10 = pnand %p1044_p9, %p1038_p4 }
  0x35   :  { %1048 = shalt.err (!%p1045_p10)
}
  0x36   :  { %s1049_s25 = scalar_lea.vmem %s50_s10, 2048  ;;  %p1054_p12 = scmp.lt.s32.totalorder %s50_s10, %s50_s10 }
  0x37   :  { %p1050_p11 = scmp.ne.s32.totalorder %s50_s10, %s1049_s25  ;;  %p1055_p13 = scmp.lt.s32.totalorder %s1049_s25, %s1049_s25 }
  0x39   :  { %p1056_p0 = por %p1055_p13, %p1054_p12 }
  0x3b   :  { %p1057_p1 = pnand %p1056_p0, %p1050_p11 }
  0x3d   :  { %1060 = shalt.err (!%p1057_p1)
}
  0x3e   :  { %55 = dma.hbm_to_vmem [thread:$0]  %s1229_s19, 2048, %s50_s10, [#allocation9], %s1165_s12, %s1166_s13, %s1167_s14  }
  0x3f   :  { %s1086_s27 = scalar_lea.hbm %s1358_s3, 2304  ;;  %s1064_s22 = scalar_lea.hbm %s1358_s3, 6144 }
  0x40   :  { %p1063_p2 = scmp.ne.s32.totalorder %s1249_s8, %s1086_s27  ;;  %p1065_p3 = scmp.lt.u32.totalorder %s1249_s8, %s1358_s3 }
  0x41   :  { %p1066_p4 = scmp.lt.u32.totalorder %s1064_s22, %s1086_s27  ;;  %p1068_p6 = scmp.lt.u32.totalorder %s1086_s27, %s1249_s8 }
  0x43   :  { %p1067_p5 = por %p1066_p4, %p1065_p3 }
  0x45   :  { %p1069_p7 = por %p1068_p6, %p1067_p5 }
  0x47   :  { %p1070_p8 = pnand %p1069_p7, %p1063_p2 }
  0x49   :  { %1073 = shalt.err (!%p1070_p8)
}
  0x4a   :  { %s1074_s19 = scalar_lea.vmem %s65_s15, 2048  ;;  %p1079_p10 = scmp.lt.s32.totalorder %s65_s15, %s65_s15 }
  0x4b   :  { %p1075_p9 = scmp.ne.s32.totalorder %s65_s15, %s1074_s19  ;;  %p1080_p11 = scmp.lt.s32.totalorder %s1074_s19, %s1074_s19 }
  0x4d   :  { %p1081_p12 = por %p1080_p11, %p1079_p10 }
  0x4f   :  { %p1082_p13 = pnand %p1081_p12, %p1075_p9 }
  0x51   :  { %1085 = shalt.err (!%p1082_p13)
}
  0x52   :  { %70 = dma.hbm_to_vmem [thread:$0]  %s1249_s8, 2048, %s65_s15, [#allocation12], %s1165_s12, %s1166_s13, %s1167_s14  }
  0x53   :  { %1153 = dma.done.wait [#allocation6], 1024  }
  0x54   :  { %1154 = vsyncadd [#allocation6], 4294966272 }
  0x55   :  { %1155 = dma.done.wait [#allocation9], 4096  }
  0x56   :  { %1156 = vsyncadd [#allocation9], 4294963200 }
  0x57   :  { %1157 = dma.done.wait [#allocation12], 2048  }
  0x58   :  { %1158 = vsyncadd [#allocation12], 4294965248  ;;  %v129_v0 = vld [vmem:[#allocation8] sm:$0xff]  ;;  %v130_v1 = vld [vmem:[#allocation8 + $0x8] sm:$0xff]  ;;  %s1170_s3 = smov [#allocation14]   ;;  %s1171_s7 = smov [#allocation13]  }
  0x59   :  { %v274_v2 = vld [vmem:[#allocation10] sm:$0xff]  ;;  %v871_v3 = vpack.c.bf16 %v130_v1, %v129_v0  ;;  %v275_v4 = vld [vmem:[#allocation10 + $0x8] sm:$0xff]  ;;  %v131_v5 = vld [vmem:[#allocation8 + $0x10] sm:$0xff]  ;;  %s632_s12 = sshll.u32 %s1170_s3, 4  ;;  %s620_s8 = sshll.u32 %s1171_s7, 4  ;;  %s633_s12 = int_to_ptr.vmem [resolvable:$true] %s632_s12  ;;  %s1303_s8 = int_to_ptr.vmem [resolvable:$true] %s620_s8 }
  0x5a   :  { %v132_v6 = vld [vmem:[#allocation8 + $0x18] sm:$0xff]  ;;  %v903_v7 = vpack.c.bf16 %v275_v4, %v274_v2  ;;  %v276_v9 = vld [vmem:[#allocation10 + $0x10] sm:$0xff]  ;;  %v133_v11 = vld [vmem:[#allocation8 + $0x20] sm:$0xff]  ;;  %s1087_s9 = scalar_lea.vmem %s633_s12, 1024  ;;  %p1092_p1 = scmp.lt.s32.totalorder %s633_s12, %s633_s12 }
  0x5b   :  { %v875_v8 = vpack.c.bf16 %v132_v6, %v131_v5  ;;  %v277_v10 = vld [vmem:[#allocation10 + $0x18] sm:$0xff]  ;;  %872 = vmatprep.subr.bf16.mxu0 %v871_v3  ;;  %v134_v13 = vld [vmem:[#allocation8 + $0x28] sm:$0xff]  ;;  %v278_v14 = vld [vmem:[#allocation10 + $0x20] sm:$0xff]  ;;  %p1088_p0 = scmp.ne.s32.totalorder %s633_s12, %s1087_s9  ;;  %p1093_p2 = scmp.lt.s32.totalorder %s1087_s9, %s1087_s9 }
  0x5c   :  { %v907_v12 = vpack.c.bf16 %v277_v10, %v276_v9  ;;  %v279_v15 = vld [vmem:[#allocation10 + $0x28] sm:$0xff]  ;;  %904 = vmatprep.subr.bf16.mxu1 %v903_v7  ;;  %874 = vmatpush3.bf16.msra.mxu0 %v871_v3  ;;  %v879_v16 = vpack.c.bf16 %v134_v13, %v133_v11  ;;  %v135_v18 = vld [vmem:[#allocation8 + $0x30] sm:$0xff]  ;;  %v136_v19 = vld [vmem:[#allocation8 + $0x38] sm:$0xff] }
  0x5d   :  { %906 = vmatpush3.bf16.msra.mxu1 %v903_v7  ;;  %876 = vmatprep.subr.bf16.mxu0 %v875_v8  ;;  %v911_v17 = vpack.c.bf16 %v279_v15, %v278_v14  ;;  %v280_v20 = vld [vmem:[#allocation10 + $0x30] sm:$0xff]  ;;  %v281_v21 = vld [vmem:[#allocation10 + $0x38] sm:$0xff]  ;;  %v883_v22 = vpack.c.bf16 %v136_v19, %v135_v18  ;;  %v137_v24 = vld [vmem:[#allocation8 + $0x40] sm:$0xff]  ;;  %p1094_p3 = por %p1093_p2, %p1092_p1 }
  0x5e   :  { %908 = vmatprep.subr.bf16.mxu1 %v907_v12  ;;  %v915_v23 = vpack.c.bf16 %v281_v21, %v280_v20  ;;  %v138_v25 = vld [vmem:[#allocation8 + $0x48] sm:$0xff]  ;;  %v1283_v26 = vld [vmem:[#allocation5] sm:$0xff]  ;;  %v139_v31 = vld [vmem:[#allocation8 + $0x50] sm:$0xff] }
  0x5f   :  { %v282_v27 = vld [vmem:[#allocation10 + $0x40] sm:$0xff]  ;;  %v283_v28 = vld [vmem:[#allocation10 + $0x48] sm:$0xff]  ;;  %771 = vmatprep.mubr.f32.mxu0 %v1283_v26  ;;  %815 = vmatprep.mubr.f32.mxu1 %v1283_v26  ;;  %v887_v29 = vpack.c.bf16 %v138_v25, %v137_v24  ;;  %v140_v32 = vld [vmem:[#allocation8 + $0x58] sm:$0xff]  ;;  %p1095_p4 = pnand %p1094_p3, %p1088_p0 }
  0x60   :  { %878 = vmatpush3.bf16.msra.mxu0 %v875_v8  ;;  %v919_v30 = vpack.c.bf16 %v283_v28, %v282_v27  ;;  %v284_v33 = vld [vmem:[#allocation10 + $0x50] sm:$0xff]  ;;  %v285_v34 = vld [vmem:[#allocation10 + $0x58] sm:$0xff]  ;;  %v891_v35 = vpack.c.bf16 %v140_v32, %v139_v31  ;;  %v141_v37 = vld [vmem:[#allocation8 + $0x60] sm:$0xff] }
  0x61   :  { %910 = vmatpush3.bf16.msra.mxu1 %v907_v12  ;;  %880 = vmatprep.subr.bf16.mxu0 %v879_v16  ;;  %v923_v36 = vpack.c.bf16 %v285_v34, %v284_v33  ;;  %v142_v38 = vld [vmem:[#allocation8 + $0x68] sm:$0xff]  ;;  %v286_v39 = vld [vmem:[#allocation10 + $0x60] sm:$0xff]  ;;  %v143_v43 = vld [vmem:[#allocation8 + $0x70] sm:$0xff] }
  0x62   :  { %912 = vmatprep.subr.bf16.mxu1 %v911_v17  ;;  %v287_v40 = vld [vmem:[#allocation10 + $0x68] sm:$0xff]  ;;  %v895_v41 = vpack.c.bf16 %v142_v38, %v141_v37  ;;  %v144_v44 = vld [vmem:[#allocation8 + $0x78] sm:$0xff]  ;;  %v288_v45 = vld [vmem:[#allocation10 + $0x70] sm:$0xff] }
  0x63   :  { %v927_v42 = vpack.c.bf16 %v287_v40, %v286_v39  ;;  %v289_v46 = vld [vmem:[#allocation10 + $0x78] sm:$0xff]  ;;  %v899_v47 = vpack.c.bf16 %v144_v44, %v143_v43  ;;  %v419_v49 = vld [vmem:[#allocation11] sm:$0xff]  ;;  %v420_v50 = vld [vmem:[#allocation11 + $0x8] sm:$0xff] }
  0x64   :  { %882 = vmatpush3.bf16.msra.mxu0 %v879_v16  ;;  %v931_v48 = vpack.c.bf16 %v289_v46, %v288_v45  ;;  %v935_v51 = vpack.c.bf16 %v420_v50, %v419_v49  ;;  %v421_v52 = vld [vmem:[#allocation11 + $0x10] sm:$0xff]  ;;  %v422_v53 = vld [vmem:[#allocation11 + $0x18] sm:$0xff]  ;;  %v1287_v54 = vld [vmem:[#allocation5 + $0x8] sm:$0xff] }
  0x65   :  { %914 = vmatpush3.bf16.msra.mxu1 %v911_v17  ;;  %884 = vmatprep.subr.bf16.mxu0 %v883_v22  ;;  %v939_v55 = vpack.c.bf16 %v422_v53, %v421_v52  ;;  %v423_v56 = vld [vmem:[#allocation11 + $0x20] sm:$0xff]  ;;  %v424_v57 = vld [vmem:[#allocation11 + $0x28] sm:$0xff]  ;;  %v1290_v58 = vld [vmem:[#allocation5 + $0x10] sm:$0xff] }
  0x66   :  { %916 = vmatprep.subr.bf16.mxu1 %v915_v23  ;;  %v1293_v59 = vld [vmem:[#allocation5 + $0x18] sm:$0xff]  ;;  %v943_v60 = vpack.c.bf16 %v424_v57, %v423_v56  ;;  %v425_v61 = vld [vmem:[#allocation11 + $0x30] sm:$0xff]  ;;  %v117_v63 = vld [vmem:[#allocation5 + $0x20] sm:$0xff] }
  0x67   :  { %v426_v62 = vld [vmem:[#allocation11 + $0x38] sm:$0xff]  ;;  %v118_v0 = vld [vmem:[#allocation5 + $0x28] sm:$0xff]  ;;  %v427_v2 = vld [vmem:[#allocation11 + $0x40] sm:$0xff] }
  0x68   :  { %886 = vmatpush3.bf16.msra.mxu0 %v883_v22  ;;  %v947_v1 = vpack.c.bf16 %v426_v62, %v425_v61  ;;  %v428_v3 = vld [vmem:[#allocation11 + $0x48] sm:$0xff]  ;;  %v119_v4 = vld [vmem:[#allocation5 + $0x30] sm:$0xff]  ;;  %v120_v5 = vld [vmem:[#allocation5 + $0x38] sm:$0xff] }
  0x69   :  { %918 = vmatpush3.bf16.msra.mxu1 %v915_v23  ;;  %888 = vmatprep.subr.bf16.mxu0 %v887_v29  ;;  %v951_v6 = vpack.c.bf16 %v428_v3, %v427_v2  ;;  %v429_v7 = vld [vmem:[#allocation11 + $0x50] sm:$0xff]  ;;  %v430_v8 = vld [vmem:[#allocation11 + $0x58] sm:$0xff]  ;;  %v431_v10 = vld [vmem:[#allocation11 + $0x60] sm:$0xff] }
  0x6a   :  { %920 = vmatprep.subr.bf16.mxu1 %v919_v30  ;;  %v955_v9 = vpack.c.bf16 %v430_v8, %v429_v7  ;;  %v432_v11 = vld [vmem:[#allocation11 + $0x68] sm:$0xff]  ;;  %v433_v13 = vld [vmem:[#allocation11 + $0x70] sm:$0xff]  ;;  %v434_v14 = vld [vmem:[#allocation11 + $0x78] sm:$0xff] }
  0x6b   :  { %v959_v12 = vpack.c.bf16 %v432_v11, %v431_v10  ;;  %v963_v15 = vpack.c.bf16 %v434_v14, %v433_v13 }
  0x6c   :  { %890 = vmatpush3.bf16.msra.mxu0 %v887_v29 }
  0x6d   :  { %922 = vmatpush3.bf16.msra.mxu1 %v919_v30  ;;  %892 = vmatprep.subr.bf16.mxu0 %v891_v35 }
  0x6e   :  { %924 = vmatprep.subr.bf16.mxu1 %v923_v36 }
  0x70   :  { %894 = vmatpush3.bf16.msra.mxu0 %v891_v35 }
  0x71   :  { %926 = vmatpush3.bf16.msra.mxu1 %v923_v36  ;;  %896 = vmatprep.subr.bf16.mxu0 %v895_v41 }
  0x72   :  { %928 = vmatprep.subr.bf16.mxu1 %v927_v42 }
  0x74   :  { %898 = vmatpush3.bf16.msra.mxu0 %v895_v41 }
  0x75   :  { %930 = vmatpush3.bf16.msra.mxu1 %v927_v42  ;;  %900 = vmatprep.subr.bf16.mxu0 %v899_v47 }
  0x76   :  { %932 = vmatprep.subr.bf16.mxu1 %v931_v48 }
  0x78   :  { %902 = vmatpush3.bf16.msra.mxu0 %v899_v47 }
  0x79   :  { %934 = vmatpush3.bf16.msra.mxu1 %v931_v48  ;;  %936 = vmatprep.subr.bf16.mxu0 %v935_v51 }
  0x7a   :  { %967 = vmatprep.subr.bf16.mxu1 %v935_v51 }
  0x7b   :  { %772 = vmatmul.mubr.f32.vlgmr.msra.gmra.mrb[0].mxu0 %v1287_v54 }
  0x7c   :  { %816 = vmatmul.mubr.f32.vlgmr.msra.gmra.mrb[0].mxu1 %v1287_v54  ;;  %938 = vmatpush3.bf16.msra.mxu0 %v935_v51 }
  0x7d   :  { %975 = vmatpush3.bf16.msra.mxu1 %v935_v51  ;;  %940 = vmatprep.subr.bf16.mxu0 %v939_v55 }
  0x7e   :  { %968 = vmatprep.subr.bf16.mxu1 %v939_v55  ;;  %774 = vmatprep.mubr.f32.mxu0 %v1290_v58 }
  0x7f   :  { %818 = vmatprep.mubr.f32.mxu1 %v1290_v58  ;;  %775 = vmatmul.mubr.f32.gmra.mrb[2].mxu0 %v1293_v59 }
  0x80   :  { %942 = vmatpush3.bf16.msra.mxu0 %v939_v55  ;;  %819 = vmatmul.mubr.f32.gmra.mrb[2].mxu1 %v1293_v59 }
  0x81   :  { %976 = vmatpush3.bf16.msra.mxu1 %v939_v55  ;;  %944 = vmatprep.subr.bf16.mxu0 %v943_v60 }
  0x82   :  { %969 = vmatprep.subr.bf16.mxu1 %v943_v60  ;;  %777 = vmatprep.mubr.f32.mxu0 %v117_v63 }
  0x83   :  { %821 = vmatprep.mubr.f32.mxu1 %v117_v63  ;;  %778 = vmatmul.mubr.f32.gmra.mrb[4].mxu0 %v118_v0 }
  0x84   :  { %946 = vmatpush3.bf16.msra.mxu0 %v943_v60  ;;  %822 = vmatmul.mubr.f32.gmra.mrb[4].mxu1 %v118_v0 }
  0x85   :  { %977 = vmatpush3.bf16.msra.mxu1 %v943_v60  ;;  %948 = vmatprep.subr.bf16.mxu0 %v947_v1 }
  0x86   :  { %970 = vmatprep.subr.bf16.mxu1 %v947_v1  ;;  %780 = vmatprep.mubr.f32.mxu0 %v119_v4 }
  0x87   :  { %824 = vmatprep.mubr.f32.mxu1 %v119_v4  ;;  %781 = vmatmul.mubr.f32.gmra.mrb[6].mxu0 %v120_v5 }
  0x88   :  { %950 = vmatpush3.bf16.msra.mxu0 %v947_v1  ;;  %825 = vmatmul.mubr.f32.gmra.mrb[6].mxu1 %v120_v5 }
  0x89   :  { %978 = vmatpush3.bf16.msra.mxu1 %v947_v1  ;;  %952 = vmatprep.subr.bf16.mxu0 %v951_v6 }
  0x8a   :  { %971 = vmatprep.subr.bf16.mxu1 %v951_v6  ;;  %859 = vmatprep.mubr.f32.mxu0 %v1283_v26 }
  0x8b   :  { %865 = vmatprep.mubr.f32.mxu1 %v117_v63 }
  0x8c   :  { %954 = vmatpush3.bf16.msra.mxu0 %v951_v6 }
  0x8d   :  { %979 = vmatpush3.bf16.msra.mxu1 %v951_v6  ;;  %956 = vmatprep.subr.bf16.mxu0 %v955_v9 }
  0x8e   :  { %972 = vmatprep.subr.bf16.mxu1 %v955_v9 }
  0x90   :  { %958 = vmatpush3.bf16.msra.mxu0 %v955_v9 }
  0x91   :  { %980 = vmatpush3.bf16.msra.mxu1 %v955_v9  ;;  %960 = vmatprep.subr.bf16.mxu0 %v959_v12 }
  0x92   :  { %973 = vmatprep.subr.bf16.mxu1 %v959_v12 }
  0x94   :  { %962 = vmatpush3.bf16.msra.mxu0 %v959_v12 }
  0x95   :  { %981 = vmatpush3.bf16.msra.mxu1 %v959_v12  ;;  %964 = vmatprep.subr.bf16.mxu0 %v963_v15 }
  0x96   :  { %974 = vmatprep.subr.bf16.mxu1 %v963_v15 }
  0x98   :  { %966 = vmatpush3.bf16.msra.mxu0 %v963_v15 }
  0x99   :  { %982 = vmatpush3.bf16.msra.mxu1 %v963_v15 }
  0x9b   :  { %860 = vmatmul.mubr.f32.vlgmr.msra.gmra.mrb[8].mxu0 %v1287_v54 }
  0x9c   :  { %866 = vmatmul.mubr.f32.vlgmr.msra.gmra.mrb[8].mxu1 %v118_v0  ;;  %862 = vmatprep.mubr.f32.mxu0 %v1290_v58 }
  0x9d   :  { %868 = vmatprep.mubr.f32.mxu1 %v119_v4 }
  0x9f   :  { %863 = vmatmul.mubr.f32.gmra.mrb[10].mxu0 %v1293_v59 }
  0xa0   :  { %869 = vmatmul.mubr.f32.gmra.mrb[10].mxu1 %v120_v5 }
 0x14e   :  { %v773_v16 = vpop.f32.mrb[0].mxu0 }
 0x14f   :  { %v568_v17 = vmul.f32 0.25, %v773_v16  ;;  %v817_v18 = vpop.f32.mrb[0].mxu1  ;;  %v211_v19 = vpop.f32.mrb[1].mxu0 }
 0x150   :  { %592 = vst [vmem:[#allocation14 + $0x8] sm:$0xff] %v817_v18  ;;  %v567_v20 = vmul.f32 0.25, %v211_v19  ;;  %v356_v21 = vpop.f32.mrb[1].mxu1 }
 0x151   :  { %576 = vst [vmem:[#allocation13 + $0x8] sm:$0xff] %v568_v17  ;;  %591 = vst [vmem:[#allocation14] sm:$0xff] %v356_v21 }
 0x152   :  { %575 = vst [vmem:[#allocation13] sm:$0xff] %v567_v20  ;;  %v776_v22 = vpop.f32.mrb[2].mxu0 }
 0x153   :  { %v570_v23 = vmul.f32 0.25, %v776_v22  ;;  %v820_v24 = vpop.f32.mrb[2].mxu1  ;;  %v221_v25 = vpop.f32.mrb[3].mxu0 }
 0x154   :  { %594 = vst [vmem:[#allocation14 + $0x18] sm:$0xff] %v820_v24  ;;  %v569_v26 = vmul.f32 0.25, %v221_v25  ;;  %v366_v27 = vpop.f32.mrb[3].mxu1 }
 0x155   :  { %578 = vst [vmem:[#allocation13 + $0x18] sm:$0xff] %v570_v23  ;;  %593 = vst [vmem:[#allocation14 + $0x10] sm:$0xff] %v366_v27 }
 0x156   :  { %577 = vst [vmem:[#allocation13 + $0x10] sm:$0xff] %v569_v26  ;;  %v779_v28 = vpop.f32.mrb[4].mxu0 }
 0x157   :  { %v572_v29 = vmul.f32 0.25, %v779_v28  ;;  %v823_v30 = vpop.f32.mrb[4].mxu1  ;;  %v231_v31 = vpop.f32.mrb[5].mxu0 }
 0x158   :  { %596 = vst [vmem:[#allocation14 + $0x28] sm:$0xff] %v823_v30  ;;  %v571_v32 = vmul.f32 0.25, %v231_v31  ;;  %v376_v33 = vpop.f32.mrb[5].mxu1 }
 0x159   :  { %580 = vst [vmem:[#allocation13 + $0x28] sm:$0xff] %v572_v29  ;;  %595 = vst [vmem:[#allocation14 + $0x20] sm:$0xff] %v376_v33 }
 0x15a   :  { %579 = vst [vmem:[#allocation13 + $0x20] sm:$0xff] %v571_v32  ;;  %v782_v34 = vpop.f32.mrb[6].mxu0 }
 0x15b   :  { %v574_v35 = vmul.f32 0.25, %v782_v34  ;;  %v826_v36 = vpop.f32.mrb[6].mxu1  ;;  %v241_v37 = vpop.f32.mrb[7].mxu0 }
 0x15c   :  { %598 = vst [vmem:[#allocation14 + $0x38] sm:$0xff] %v826_v36  ;;  %v573_v38 = vmul.f32 0.25, %v241_v37  ;;  %v386_v39 = vpop.f32.mrb[7].mxu1 }
 0x15d   :  { %582 = vst [vmem:[#allocation13 + $0x38] sm:$0xff] %v574_v35  ;;  %597 = vst [vmem:[#allocation14 + $0x30] sm:$0xff] %v386_v39 }
 0x15e   :  { %581 = vst [vmem:[#allocation13 + $0x30] sm:$0xff] %v573_v38 }
 0x15f   :  { %1098 = shalt.err (!%p1095_p4)
}
 0x160   :  { %s1099_s15 = scalar_lea.hbm %s1360_s5, 1024 }
 0x161   :  { %p1100_p5 = scmp.ne.s32.totalorder %s1360_s5, %s1099_s15  ;;  %p1103_p6 = scmp.lt.u32.totalorder %s1099_s15, %s1360_s5 }
 0x163   :  { %p1105_p7 = pnand %p1103_p6, %p1100_p5 }
 0x165   :  { %1108 = shalt.err (!%p1105_p7)
}
 0x166   :  { %638 = dma.vmem_to_hbm [thread:$0]  %s633_s12, 1024, %s1360_s5, [#allocation15], %s1166_s13, %s1166_s13, %s1167_s14  }
 0x167   :  { %s1109_s0 = scalar_lea.vmem %s1303_s8, 1024  ;;  %p1114_p9 = scmp.lt.s32.totalorder %s1303_s8, %s1303_s8 }
 0x168   :  { %p1110_p8 = scmp.ne.s32.totalorder %s1303_s8, %s1109_s0  ;;  %p1115_p10 = scmp.lt.s32.totalorder %s1109_s0, %s1109_s0 }
 0x16a   :  { %p1116_p11 = por %p1115_p10, %p1114_p9 }
 0x16c   :  { %p1117_p12 = pnand %p1116_p11, %p1110_p8 }
 0x16e   :  { %1120 = shalt.err (!%p1117_p12)
}
 0x16f   :  { %s1121_s2 = scalar_lea.hbm %s1359_s4, 1024 }
 0x170   :  { %p1122_p13 = scmp.ne.s32.totalorder %s1359_s4, %s1121_s2  ;;  %p1125_p0 = scmp.lt.u32.totalorder %s1121_s2, %s1359_s4 }
 0x172   :  { %p1127_p1 = pnand %p1125_p0, %p1122_p13 }
 0x174   :  { %1130 = shalt.err (!%p1127_p1)
}
 0x175   :  { %626 = dma.vmem_to_hbm [thread:$0]  %s1303_s8, 1024, %s1359_s4, [#allocation7], %s1166_s13, %s1166_s13, %s1167_s14   ;;  %v861_v40 = vpop.f32.mrb[8].mxu0  ;;  %v867_v41 = vpop.f32.mrb[8].mxu1 }
 0x176   :  { %608 = vst [vmem:[#allocation16 + $0x8] sm:$0xff] %v861_v40  ;;  %v501_v42 = vpop.f32.mrb[9].mxu0  ;;  %612 = vst [vmem:[#allocation16 + $0x28] sm:$0xff] %v867_v41  ;;  %v521_v43 = vpop.f32.mrb[9].mxu1  ;;  %s1172_s29 = smov [#allocation16]  }
 0x177   :  { %607 = vst [vmem:[#allocation16] sm:$0xff] %v501_v42  ;;  %s644_s30 = sshll.u32 %s1172_s29, 4  ;;  %611 = vst [vmem:[#allocation16 + $0x20] sm:$0xff] %v521_v43  ;;  %v864_v44 = vpop.f32.mrb[10].mxu0  ;;  %v870_v45 = vpop.f32.mrb[10].mxu1  ;;  %s645_s30 = int_to_ptr.vmem [resolvable:$true] %s644_s30 }
 0x178   :  { %610 = vst [vmem:[#allocation16 + $0x18] sm:$0xff] %v864_v44  ;;  %v511_v46 = vpop.f32.mrb[11].mxu0  ;;  %614 = vst [vmem:[#allocation16 + $0x38] sm:$0xff] %v870_v45  ;;  %v531_v47 = vpop.f32.mrb[11].mxu1  ;;  %s1131_s4 = scalar_lea.vmem %s645_s30, 1024  ;;  %p1136_p3 = scmp.lt.s32.totalorder %s645_s30, %s645_s30 }
 0x179   :  { %609 = vst [vmem:[#allocation16 + $0x10] sm:$0xff] %v511_v46  ;;  %613 = vst [vmem:[#allocation16 + $0x30] sm:$0xff] %v531_v47  ;;  %p1132_p2 = scmp.ne.s32.totalorder %s645_s30, %s1131_s4  ;;  %p1137_p4 = scmp.lt.s32.totalorder %s1131_s4, %s1131_s4 }
 0x17b   :  { %p1138_p5 = por %p1137_p4, %p1136_p3 }
 0x17d   :  { %p1139_p6 = pnand %p1138_p5, %p1132_p2 }
 0x17f   :  { %1142 = shalt.err (!%p1139_p6)
}
 0x180   :  { %s1143_s12 = scalar_lea.hbm %s1361_s6, 1024 }
 0x181   :  { %p1144_p7 = scmp.ne.s32.totalorder %s1361_s6, %s1143_s12  ;;  %p1147_p8 = scmp.lt.u32.totalorder %s1143_s12, %s1361_s6 }
 0x183   :  { %p1149_p9 = pnand %p1147_p8, %p1144_p7 }
 0x185   :  { %1152 = shalt.err (!%p1149_p9)
}
 0x186   :  { %650 = dma.vmem_to_hbm [thread:$0]  %s645_s30, 1024, %s1361_s6, [#allocation15], %s1166_s13, %s1166_s13, %s1167_s14  }
 0x187   :  { %1159 = dma.done.wait [#allocation7], 1024  }
 0x188   :  { %1160 = vsyncadd [#allocation7], 4294966272 }
 0x189   :  { %1161 = dma.done.wait [#allocation15], 2048  }
 0x18a   :  { %1162 = vsyncadd [#allocation15], 4294965248 }
 0x18b   :  { %660 = vsyncpa [#allocation6], 1 }
 0x18c   :  { %661 = vsyncpa [#allocation9], 1 }
 0x18d   :  { %662 = vsyncpa [#allocation12], 1 }
 0x18e   :  { %663 = vsyncpa [#allocation7], 1 }
 0x18f   :  { %664 = vsyncpa [#allocation15], 1 }

</bundles_post_ra>
